<compile_context>
chip_gen: v7x
topology: tpu7x:2x2x1
jax: 0.10.0
libtpu: 0.0.40
codegen_flags: <defaults>
</compile_context>

<pallas_src>
import jax
import jax.numpy as jnp
from jax.experimental import pallas as pl
from jax.experimental.pallas import tpu as pltpu

NUM_UIDS = 128       # simulated metagraph.uids
DATASET_SIZE = 64    # len(self.dataset)
MAX_ANSWERS = 8      # len(answer) choices per dataset item (synthetic)

_UNIFORM_BITS = 24   # fixed-point resolution of the fail/fitness thresholds


def _i32(v):
    """uint32 literal -> int32 two's-complement constant."""
    return jnp.int32(v - (1 << 32) if v >= (1 << 31) else v)


def _lsr(x, k):
    """Logical right shift for int32 (arithmetic shift + mask of sign bits)."""
    return (x >> k) & jnp.int32((1 << (32 - k)) - 1)


def _hash_i32(x):
    """splitmix32-style finalizer; pure int32 VPU ops (no TPU-only PRNG)."""
    x = x ^ _lsr(x, 16)
    x = x * _i32(0x7FEB352D)
    x = x ^ _lsr(x, 15)
    x = x * _i32(0x846CA68B)
    x = x ^ _lsr(x, 16)
    return x


def dendrite_kernel(scalars_ref, thresh_ref, out_ref):
    bsz = out_ref.shape[0]
    n = thresh_ref.shape[1]

    thr = thresh_ref[...]            # (2, n) fixed-point thresholds (staged once)
    thr_fail = thr[0:1]              # (1, n)
    thr_fit = thr[1:2]               # (1, n)

    # Counter grid shared by all batch rows; hoisted out of the unrolled loop.
    rows = jax.lax.broadcasted_iota(jnp.int32, (4, n), 0)
    cols = jax.lax.broadcasted_iota(jnp.int32, (4, n), 1)
    ctr = rows * jnp.int32(n) + cols                       # unique per (stream, uid)

    zeros5 = jnp.zeros((5, n), jnp.int32)
    minus1 = jnp.int32(-1)

    # bsz is a static trace-time constant (tiny) -> fully unrolled.
    for bi in range(bsz):
        seed          = scalars_ref[bi, 0]
        is_question   = scalars_ref[bi, 1]   # 1 if messages[-1] == __default_question_prompt__
        matched_index = scalars_ref[bi, 2]   # questions.index(messages[-1])
        dataset_size  = scalars_ref[bi, 3]
        max_answers   = scalars_ref[bi, 4]

        # 4 independent per-uid random streams from one vreg-dense draw.
        b_mix = _i32((bi * 0x85EBCA6B) & 0xFFFFFFFF)
        bits = _hash_i32(ctr ^ (seed * _i32(0x9E3779B9)) ^ b_mix)   # (4, n)

        u24 = _lsr(bits, 32 - _UNIFORM_BITS)   # uniform in [0, 2^24)
        u16 = _lsr(bits, 16)                   # uniform in [0, 2^16)

        # if random.random() < fail_rate.get(uid, baseline): return DummyRPCResponse()
        fail = u24[0:1] < thr_fail

        # if not is_question and random.random() < fitness.get(uid, 0): match question
        use_match = jnp.logical_and(is_question == 0, u24[1:2] < thr_fit)

        # else: index = random.randint(0, len(dataset) - 1)   (integer fixed-point)
        rand_idx = (u16[2:3] * dataset_size) >> 16
        idx = jnp.where(use_match, matched_index, rand_idx)

        # answer = answer[random.randint(0, len(answer) - 1)]
        ans_sub = (u16[3:4] * max_answers) >> 16

        qidx_row = jnp.where(fail, minus1, idx)
        ans_row = jnp.where(fail, minus1, ans_sub)
        fail_row = fail.astype(jnp.int32)

        # One lane-dense store of the fused (8, N) output slab for this batch row.
        out_ref[bi] = jnp.concatenate([qidx_row, fail_row, ans_row, zeros5], axis=0)
    # TODO(synk): dataset text lookup, completion/alternative string assembly,
    # ' '-padding of the answer and the history queue have no tensor
    # equivalent; host-side glue consumes the indices/masks emitted here.


def make_thresholds(fail_rate, fitness):
    """Stage per-uid probabilities once as a fused (2, N) int32 fixed-point slab."""
    probs = jnp.clip(jnp.stack([fail_rate, fitness]).astype(jnp.float32), 0.0, 1.0)
    return jnp.round(probs * float(1 << _UNIFORM_BITS)).astype(jnp.int32)


def dummy_dendrite_forward(seeds, is_question, matched_index, thresholds,
                           dataset_size=DATASET_SIZE, max_answers=MAX_ANSWERS):
    seeds = jnp.asarray(seeds, jnp.int32).reshape(-1)
    bsz = seeds.shape[0]
    n = thresholds.shape[1]
    is_question = jnp.broadcast_to(
        jnp.asarray(is_question, jnp.int32).reshape(-1), (bsz,))
    matched_index = jnp.broadcast_to(
        jnp.asarray(matched_index, jnp.int32).reshape(-1), (bsz,))
    scalars = jnp.stack(
        [seeds, is_question, matched_index,
         jnp.full((bsz,), dataset_size, jnp.int32),
         jnp.full((bsz,), max_answers, jnp.int32)], axis=1)     # (B, 5) -> SMEM

    out = pl.pallas_call(
        dendrite_kernel,
        out_shape=jax.ShapeDtypeStruct((bsz, 8, n), jnp.int32),
        in_specs=[
            pl.BlockSpec(memory_space=pltpu.MemorySpace.SMEM),   # per-call scalars
            pl.BlockSpec(memory_space=pltpu.MemorySpace.VMEM),   # (2, N) thresholds
        ],
        out_specs=pl.BlockSpec(memory_space=pltpu.MemorySpace.VMEM),
    )(scalars, thresholds)

    qidx = out[:, 0, :]      # dataset index, -1 on fail
    fail = out[:, 1, :]      # 1 = DummyRPCResponse() with no content
    ans_sub = out[:, 2, :]   # answer variant index, -1 on fail
    return qidx, fail, ans_sub


if __name__ == "__main__":
    key = jax.random.PRNGKey(0)
    k_fail, k_fit = jax.random.split(key)

    # Deterministic per-uid config mirroring __init__: baseline_fail_rate = 0.1
    # with a few uid overrides; fitness baseline 0.0 with a few uid overrides.
    fail_rate = jnp.full((NUM_UIDS,), 0.1, jnp.float32)
    fail_rate = fail_rate.at[jnp.array([3, 17, 42])].set(
        jax.random.uniform(k_fail, (3,), minval=0.3, maxval=0.9))
    fitness = jnp.zeros((NUM_UIDS,), jnp.float32)
    fitness = fitness.at[jnp.array([9, 77])].set(
        jax.random.uniform(k_fit, (2,), minval=0.5, maxval=1.0))
    fitness = fitness.at[5].set(1.0)   # uid 5 always matches (when not is_question)

    thresholds = make_thresholds(fail_rate, fitness)   # staged once, reused

    # Batch of 4 independent forward() calls, each with its own seed so
    # repeated calls do not reproduce identical draws.
    seeds = jnp.array([1234, 1235, 1236, 1237], jnp.int32)
    is_question = jnp.array([0, 1, 0, 1], jnp.int32)
    matched_index = jnp.array([7, 7, 7, 7], jnp.int32)

    fwd = jax.jit(dummy_dendrite_forward)
    qidx, fail, ans_sub = fwd(seeds, is_question, matched_index, thresholds)
    jax.block_until_ready((qidx, fail, ans_sub))

    B = seeds.shape[0]
    assert qidx.shape == (B, NUM_UIDS)
    assert fail.shape == (B, NUM_UIDS)
    assert ans_sub.shape == (B, NUM_UIDS)

    # Failed uids must carry -1 indices; successful ones must be in range.
    ok_idx = jnp.where(fail == 1,
                       qidx == -1,
                       (qidx >= 0) & (qidx < DATASET_SIZE))
    ok_ans = jnp.where(fail == 1,
                       ans_sub == -1,
                       (ans_sub >= 0) & (ans_sub < MAX_ANSWERS))
    assert bool(jnp.all(ok_idx)) and bool(jnp.all(ok_ans))
    # uid 5 has fitness 1.0: with is_question == 0 it must match the prompt
    # index (unless the fail branch triggered).
    assert bool((qidx[0, 5] == 7) | (fail[0, 5] == 1))
    assert bool((qidx[2, 5] == 7) | (fail[2, 5] == 1))
    # Different seeds must not reproduce identical draws.
    assert not bool(jnp.all(qidx[0] == qidx[1]))

    print("KERNEL_OK")
</pallas_src>

<mosaic_0001>
module attributes {stable_mosaic.version = 11 : i64} {
  func.func @dendrite_kernel(%arg0: memref<4x5xi32, #tpu.memory_space<smem>>, %arg1: memref<2x128xi32, #tpu.memory_space<vmem>>, %arg2: memref<4x8x128xi32, #tpu.memory_space<vmem>>) attributes {dimension_semantics = [], scalar_prefetch = 0 : i64, scratch_operands = 0 : i64, tpu.core_type = #tpu.core_type<tc>} {
    %c0 = arith.constant 0 : index
    %c0_0 = arith.constant 0 : index
    %0 = vector.load %arg1[%c0, %c0_0] : memref<2x128xi32, #tpu.memory_space<vmem>>, vector<2x128xi32>
    %1 = vector.extract_strided_slice %0 {offsets = [0, 0], sizes = [1, 128], strides = [1, 1]} : vector<2x128xi32> to vector<1x128xi32>
    %2 = vector.extract_strided_slice %0 {offsets = [1, 0], sizes = [1, 128], strides = [1, 1]} : vector<2x128xi32> to vector<1x128xi32>
    %3 = tpu.iota {dimensions = array<i32: 0>} : vector<4x128xi32>
    %4 = tpu.iota {dimensions = array<i32: 1>} : vector<4x128xi32>
    %c128_i32 = arith.constant 128 : i32
    %5 = vector.broadcast %c128_i32 : i32 to vector<4x128xi32>
    %6 = arith.muli %3, %5 : vector<4x128xi32>
    %7 = arith.addi %6, %4 : vector<4x128xi32>
    %c0_i32 = arith.constant 0 : i32
    %8 = vector.broadcast %c0_i32 : i32 to vector<5x128xi32>
    %c0_1 = arith.constant 0 : index
    %c0_2 = arith.constant 0 : index
    %9 = memref.load %arg0[%c0_1, %c0_2] : memref<4x5xi32, #tpu.memory_space<smem>>
    %c0_3 = arith.constant 0 : index
    %c1 = arith.constant 1 : index
    %10 = memref.load %arg0[%c0_3, %c1] : memref<4x5xi32, #tpu.memory_space<smem>>
    %c0_4 = arith.constant 0 : index
    %c2 = arith.constant 2 : index
    %11 = memref.load %arg0[%c0_4, %c2] : memref<4x5xi32, #tpu.memory_space<smem>>
    %c0_5 = arith.constant 0 : index
    %c3 = arith.constant 3 : index
    %12 = memref.load %arg0[%c0_5, %c3] : memref<4x5xi32, #tpu.memory_space<smem>>
    %c0_6 = arith.constant 0 : index
    %c4 = arith.constant 4 : index
    %13 = memref.load %arg0[%c0_6, %c4] : memref<4x5xi32, #tpu.memory_space<smem>>
    %c-1640531527_i32 = arith.constant -1640531527 : i32
    %14 = arith.muli %9, %c-1640531527_i32 : i32
    %15 = vector.broadcast %14 : i32 to vector<4x128xi32>
    %16 = arith.xori %7, %15 : vector<4x128xi32>
    %c0_i32_7 = arith.constant 0 : i32
    %17 = vector.broadcast %c0_i32_7 : i32 to vector<4x128xi32>
    %18 = arith.xori %16, %17 : vector<4x128xi32>
    %c16_i32 = arith.constant 16 : i32
    %19 = vector.broadcast %c16_i32 : i32 to vector<4x128xi32>
    %20 = arith.shrsi %18, %19 : vector<4x128xi32>
    %c65535_i32 = arith.constant 65535 : i32
    %21 = vector.broadcast %c65535_i32 : i32 to vector<4x128xi32>
    %22 = arith.andi %20, %21 : vector<4x128xi32>
    %23 = arith.xori %18, %22 : vector<4x128xi32>
    %c2146121005_i32 = arith.constant 2146121005 : i32
    %24 = vector.broadcast %c2146121005_i32 : i32 to vector<4x128xi32>
    %25 = arith.muli %23, %24 : vector<4x128xi32>
    %c15_i32 = arith.constant 15 : i32
    %26 = vector.broadcast %c15_i32 : i32 to vector<4x128xi32>
    %27 = arith.shrsi %25, %26 : vector<4x128xi32>
    %c131071_i32 = arith.constant 131071 : i32
    %28 = vector.broadcast %c131071_i32 : i32 to vector<4x128xi32>
    %29 = arith.andi %27, %28 : vector<4x128xi32>
    %30 = arith.xori %25, %29 : vector<4x128xi32>
    %c-2073254261_i32 = arith.constant -2073254261 : i32
    %31 = vector.broadcast %c-2073254261_i32 : i32 to vector<4x128xi32>
    %32 = arith.muli %30, %31 : vector<4x128xi32>
    %c16_i32_8 = arith.constant 16 : i32
    %33 = vector.broadcast %c16_i32_8 : i32 to vector<4x128xi32>
    %34 = arith.shrsi %32, %33 : vector<4x128xi32>
    %c65535_i32_9 = arith.constant 65535 : i32
    %35 = vector.broadcast %c65535_i32_9 : i32 to vector<4x128xi32>
    %36 = arith.andi %34, %35 : vector<4x128xi32>
    %37 = arith.xori %32, %36 : vector<4x128xi32>
    %c8_i32 = arith.constant 8 : i32
    %38 = vector.broadcast %c8_i32 : i32 to vector<4x128xi32>
    %39 = arith.shrsi %37, %38 : vector<4x128xi32>
    %c16777215_i32 = arith.constant 16777215 : i32
    %40 = vector.broadcast %c16777215_i32 : i32 to vector<4x128xi32>
    %41 = arith.andi %39, %40 : vector<4x128xi32>
    %c16_i32_10 = arith.constant 16 : i32
    %42 = vector.broadcast %c16_i32_10 : i32 to vector<4x128xi32>
    %43 = arith.shrsi %37, %42 : vector<4x128xi32>
    %c65535_i32_11 = arith.constant 65535 : i32
    %44 = vector.broadcast %c65535_i32_11 : i32 to vector<4x128xi32>
    %45 = arith.andi %43, %44 : vector<4x128xi32>
    %46 = vector.extract_strided_slice %41 {offsets = [0, 0], sizes = [1, 128], strides = [1, 1]} : vector<4x128xi32> to vector<1x128xi32>
    %47 = arith.cmpi slt, %46, %1 : vector<1x128xi32>
    %c0_i32_12 = arith.constant 0 : i32
    %48 = arith.cmpi eq, %10, %c0_i32_12 : i32
    %49 = vector.extract_strided_slice %41 {offsets = [1, 0], sizes = [1, 128], strides = [1, 1]} : vector<4x128xi32> to vector<1x128xi32>
    %50 = arith.cmpi slt, %49, %2 : vector<1x128xi32>
    %51 = vector.broadcast %48 : i1 to vector<1x128xi1>
    %52 = arith.andi %51, %50 : vector<1x128xi1>
    %53 = vector.extract_strided_slice %45 {offsets = [2, 0], sizes = [1, 128], strides = [1, 1]} : vector<4x128xi32> to vector<1x128xi32>
    %54 = vector.broadcast %12 : i32 to vector<1x128xi32>
    %55 = arith.muli %53, %54 : vector<1x128xi32>
    %c16_i32_13 = arith.constant 16 : i32
    %56 = vector.broadcast %c16_i32_13 : i32 to vector<1x128xi32>
    %57 = arith.shrsi %55, %56 : vector<1x128xi32>
    %58 = vector.broadcast %11 : i32 to vector<1x128xi32>
    %59 = arith.select %52, %58, %57 : vector<1x128xi1>, vector<1x128xi32>
    %60 = vector.extract_strided_slice %45 {offsets = [3, 0], sizes = [1, 128], strides = [1, 1]} : vector<4x128xi32> to vector<1x128xi32>
    %61 = vector.broadcast %13 : i32 to vector<1x128xi32>
    %62 = arith.muli %60, %61 : vector<1x128xi32>
    %c16_i32_14 = arith.constant 16 : i32
    %63 = vector.broadcast %c16_i32_14 : i32 to vector<1x128xi32>
    %64 = arith.shrsi %62, %63 : vector<1x128xi32>
    %c-1_i32 = arith.constant -1 : i32
    %65 = vector.broadcast %c-1_i32 : i32 to vector<1x128xi32>
    %66 = arith.select %47, %65, %59 : vector<1x128xi1>, vector<1x128xi32>
    %c-1_i32_15 = arith.constant -1 : i32
    %67 = vector.broadcast %c-1_i32_15 : i32 to vector<1x128xi32>
    %68 = arith.select %47, %67, %64 : vector<1x128xi1>, vector<1x128xi32>
    %69 = arith.extui %47 : vector<1x128xi1> to vector<1x128xi32>
    %70 = tpu.concatenate %66, %69, %68, %8 in 0 : vector<1x128xi32>, vector<1x128xi32>, vector<1x128xi32>, vector<5x128xi32> -> vector<8x128xi32>
    %c0_16 = arith.constant 0 : index
    %c0_17 = arith.constant 0 : index
    %c0_18 = arith.constant 0 : index
    %71 = vector.load %arg2[%c0_16, %c0_17, %c0_18] : memref<4x8x128xi32, #tpu.memory_space<vmem>>, vector<1x8x128xi32>
    %72 = vector.shape_cast %71 : vector<1x8x128xi32> to vector<8x128xi32>
    %73 = vector.shape_cast %70 : vector<8x128xi32> to vector<1x8x128xi32>
    tpu.vector_store %arg2[%c0_16, %c0_17, %c0_18], %73 {strides = array<i32>} : memref<4x8x128xi32, #tpu.memory_space<vmem>>, vector<1x8x128xi32>,
    %c1_19 = arith.constant 1 : index
    %c0_20 = arith.constant 0 : index
    %74 = memref.load %arg0[%c1_19, %c0_20] : memref<4x5xi32, #tpu.memory_space<smem>>
    %c1_21 = arith.constant 1 : index
    %c1_22 = arith.constant 1 : index
    %75 = memref.load %arg0[%c1_21, %c1_22] : memref<4x5xi32, #tpu.memory_space<smem>>
    %c1_23 = arith.constant 1 : index
    %c2_24 = arith.constant 2 : index
    %76 = memref.load %arg0[%c1_23, %c2_24] : memref<4x5xi32, #tpu.memory_space<smem>>
    %c1_25 = arith.constant 1 : index
    %c3_26 = arith.constant 3 : index
    %77 = memref.load %arg0[%c1_25, %c3_26] : memref<4x5xi32, #tpu.memory_space<smem>>
    %c1_27 = arith.constant 1 : index
    %c4_28 = arith.constant 4 : index
    %78 = memref.load %arg0[%c1_27, %c4_28] : memref<4x5xi32, #tpu.memory_space<smem>>
    %c-1640531527_i32_29 = arith.constant -1640531527 : i32
    %79 = arith.muli %74, %c-1640531527_i32_29 : i32
    %80 = vector.broadcast %79 : i32 to vector<4x128xi32>
    %81 = arith.xori %7, %80 : vector<4x128xi32>
    %c-2048144789_i32 = arith.constant -2048144789 : i32
    %82 = vector.broadcast %c-2048144789_i32 : i32 to vector<4x128xi32>
    %83 = arith.xori %81, %82 : vector<4x128xi32>
    %c16_i32_30 = arith.constant 16 : i32
    %84 = vector.broadcast %c16_i32_30 : i32 to vector<4x128xi32>
    %85 = arith.shrsi %83, %84 : vector<4x128xi32>
    %c65535_i32_31 = arith.constant 65535 : i32
    %86 = vector.broadcast %c65535_i32_31 : i32 to vector<4x128xi32>
    %87 = arith.andi %85, %86 : vector<4x128xi32>
    %88 = arith.xori %83, %87 : vector<4x128xi32>
    %c2146121005_i32_32 = arith.constant 2146121005 : i32
    %89 = vector.broadcast %c2146121005_i32_32 : i32 to vector<4x128xi32>
    %90 = arith.muli %88, %89 : vector<4x128xi32>
    %c15_i32_33 = arith.constant 15 : i32
    %91 = vector.broadcast %c15_i32_33 : i32 to vector<4x128xi32>
    %92 = arith.shrsi %90, %91 : vector<4x128xi32>
    %c131071_i32_34 = arith.constant 131071 : i32
    %93 = vector.broadcast %c131071_i32_34 : i32 to vector<4x128xi32>
    %94 = arith.andi %92, %93 : vector<4x128xi32>
    %95 = arith.xori %90, %94 : vector<4x128xi32>
    %c-2073254261_i32_35 = arith.constant -2073254261 : i32
    %96 = vector.broadcast %c-2073254261_i32_35 : i32 to vector<4x128xi32>
    %97 = arith.muli %95, %96 : vector<4x128xi32>
    %c16_i32_36 = arith.constant 16 : i32
    %98 = vector.broadcast %c16_i32_36 : i32 to vector<4x128xi32>
    %99 = arith.shrsi %97, %98 : vector<4x128xi32>
    %c65535_i32_37 = arith.constant 65535 : i32
    %100 = vector.broadcast %c65535_i32_37 : i32 to vector<4x128xi32>
    %101 = arith.andi %99, %100 : vector<4x128xi32>
    %102 = arith.xori %97, %101 : vector<4x128xi32>
    %c8_i32_38 = arith.constant 8 : i32
    %103 = vector.broadcast %c8_i32_38 : i32 to vector<4x128xi32>
    %104 = arith.shrsi %102, %103 : vector<4x128xi32>
    %c16777215_i32_39 = arith.constant 16777215 : i32
    %105 = vector.broadcast %c16777215_i32_39 : i32 to vector<4x128xi32>
    %106 = arith.andi %104, %105 : vector<4x128xi32>
    %c16_i32_40 = arith.constant 16 : i32
    %107 = vector.broadcast %c16_i32_40 : i32 to vector<4x128xi32>
    %108 = arith.shrsi %102, %107 : vector<4x128xi32>
    %c65535_i32_41 = arith.constant 65535 : i32
    %109 = vector.broadcast %c65535_i32_41 : i32 to vector<4x128xi32>
    %110 = arith.andi %108, %109 : vector<4x128xi32>
    %111 = vector.extract_strided_slice %106 {offsets = [0, 0], sizes = [1, 128], strides = [1, 1]} : vector<4x128xi32> to vector<1x128xi32>
    %112 = arith.cmpi slt, %111, %1 : vector<1x128xi32>
    %c0_i32_42 = arith.constant 0 : i32
    %113 = arith.cmpi eq, %75, %c0_i32_42 : i32
    %114 = vector.extract_strided_slice %106 {offsets = [1, 0], sizes = [1, 128], strides = [1, 1]} : vector<4x128xi32> to vector<1x128xi32>
    %115 = arith.cmpi slt, %114, %2 : vector<1x128xi32>
    %116 = vector.broadcast %113 : i1 to vector<1x128xi1>
    %117 = arith.andi %116, %115 : vector<1x128xi1>
    %118 = vector.extract_strided_slice %110 {offsets = [2, 0], sizes = [1, 128], strides = [1, 1]} : vector<4x128xi32> to vector<1x128xi32>
    %119 = vector.broadcast %77 : i32 to vector<1x128xi32>
    %120 = arith.muli %118, %119 : vector<1x128xi32>
    %c16_i32_43 = arith.constant 16 : i32
    %121 = vector.broadcast %c16_i32_43 : i32 to vector<1x128xi32>
    %122 = arith.shrsi %120, %121 : vector<1x128xi32>
    %123 = vector.broadcast %76 : i32 to vector<1x128xi32>
    %124 = arith.select %117, %123, %122 : vector<1x128xi1>, vector<1x128xi32>
    %125 = vector.extract_strided_slice %110 {offsets = [3, 0], sizes = [1, 128], strides = [1, 1]} : vector<4x128xi32> to vector<1x128xi32>
    %126 = vector.broadcast %78 : i32 to vector<1x128xi32>
    %127 = arith.muli %125, %126 : vector<1x128xi32>
    %c16_i32_44 = arith.constant 16 : i32
    %128 = vector.broadcast %c16_i32_44 : i32 to vector<1x128xi32>
    %129 = arith.shrsi %127, %128 : vector<1x128xi32>
    %c-1_i32_45 = arith.constant -1 : i32
    %130 = vector.broadcast %c-1_i32_45 : i32 to vector<1x128xi32>
    %131 = arith.select %112, %130, %124 : vector<1x128xi1>, vector<1x128xi32>
    %c-1_i32_46 = arith.constant -1 : i32
    %132 = vector.broadcast %c-1_i32_46 : i32 to vector<1x128xi32>
    %133 = arith.select %112, %132, %129 : vector<1x128xi1>, vector<1x128xi32>
    %134 = arith.extui %112 : vector<1x128xi1> to vector<1x128xi32>
    %135 = tpu.concatenate %131, %134, %133, %8 in 0 : vector<1x128xi32>, vector<1x128xi32>, vector<1x128xi32>, vector<5x128xi32> -> vector<8x128xi32>
    %c1_47 = arith.constant 1 : index
    %c0_48 = arith.constant 0 : index
    %c0_49 = arith.constant 0 : index
    %136 = vector.load %arg2[%c1_47, %c0_48, %c0_49] : memref<4x8x128xi32, #tpu.memory_space<vmem>>, vector<1x8x128xi32>
    %137 = vector.shape_cast %136 : vector<1x8x128xi32> to vector<8x128xi32>
    %138 = vector.shape_cast %135 : vector<8x128xi32> to vector<1x8x128xi32>
    tpu.vector_store %arg2[%c1_47, %c0_48, %c0_49], %138 {strides = array<i32>} : memref<4x8x128xi32, #tpu.memory_space<vmem>>, vector<1x8x128xi32>,
    %c2_50 = arith.constant 2 : index
    %c0_51 = arith.constant 0 : index
    %139 = memref.load %arg0[%c2_50, %c0_51] : memref<4x5xi32, #tpu.memory_space<smem>>
    %c2_52 = arith.constant 2 : index
    %c1_53 = arith.constant 1 : index
    %140 = memref.load %arg0[%c2_52, %c1_53] : memref<4x5xi32, #tpu.memory_space<smem>>
    %c2_54 = arith.constant 2 : index
    %c2_55 = arith.constant 2 : index
    %141 = memref.load %arg0[%c2_54, %c2_55] : memref<4x5xi32, #tpu.memory_space<smem>>
    %c2_56 = arith.constant 2 : index
    %c3_57 = arith.constant 3 : index
    %142 = memref.load %arg0[%c2_56, %c3_57] : memref<4x5xi32, #tpu.memory_space<smem>>
    %c2_58 = arith.constant 2 : index
    %c4_59 = arith.constant 4 : index
    %143 = memref.load %arg0[%c2_58, %c4_59] : memref<4x5xi32, #tpu.memory_space<smem>>
    %c-1640531527_i32_60 = arith.constant -1640531527 : i32
    %144 = arith.muli %139, %c-1640531527_i32_60 : i32
    %145 = vector.broadcast %144 : i32 to vector<4x128xi32>
    %146 = arith.xori %7, %145 : vector<4x128xi32>
    %c198677718_i32 = arith.constant 198677718 : i32
    %147 = vector.broadcast %c198677718_i32 : i32 to vector<4x128xi32>
    %148 = arith.xori %146, %147 : vector<4x128xi32>
    %c16_i32_61 = arith.constant 16 : i32
    %149 = vector.broadcast %c16_i32_61 : i32 to vector<4x128xi32>
    %150 = arith.shrsi %148, %149 : vector<4x128xi32>
    %c65535_i32_62 = arith.constant 65535 : i32
    %151 = vector.broadcast %c65535_i32_62 : i32 to vector<4x128xi32>
    %152 = arith.andi %150, %151 : vector<4x128xi32>
    %153 = arith.xori %148, %152 : vector<4x128xi32>
    %c2146121005_i32_63 = arith.constant 2146121005 : i32
    %154 = vector.broadcast %c2146121005_i32_63 : i32 to vector<4x128xi32>
    %155 = arith.muli %153, %154 : vector<4x128xi32>
    %c15_i32_64 = arith.constant 15 : i32
    %156 = vector.broadcast %c15_i32_64 : i32 to vector<4x128xi32>
    %157 = arith.shrsi %155, %156 : vector<4x128xi32>
    %c131071_i32_65 = arith.constant 131071 : i32
    %158 = vector.broadcast %c131071_i32_65 : i32 to vector<4x128xi32>
    %159 = arith.andi %157, %158 : vector<4x128xi32>
    %160 = arith.xori %155, %159 : vector<4x128xi32>
    %c-2073254261_i32_66 = arith.constant -2073254261 : i32
    %161 = vector.broadcast %c-2073254261_i32_66 : i32 to vector<4x128xi32>
    %162 = arith.muli %160, %161 : vector<4x128xi32>
    %c16_i32_67 = arith.constant 16 : i32
    %163 = vector.broadcast %c16_i32_67 : i32 to vector<4x128xi32>
    %164 = arith.shrsi %162, %163 : vector<4x128xi32>
    %c65535_i32_68 = arith.constant 65535 : i32
    %165 = vector.broadcast %c65535_i32_68 : i32 to vector<4x128xi32>
    %166 = arith.andi %164, %165 : vector<4x128xi32>
    %167 = arith.xori %162, %166 : vector<4x128xi32>
    %c8_i32_69 = arith.constant 8 : i32
    %168 = vector.broadcast %c8_i32_69 : i32 to vector<4x128xi32>
    %169 = arith.shrsi %167, %168 : vector<4x128xi32>
    %c16777215_i32_70 = arith.constant 16777215 : i32
    %170 = vector.broadcast %c16777215_i32_70 : i32 to vector<4x128xi32>
    %171 = arith.andi %169, %170 : vector<4x128xi32>
    %c16_i32_71 = arith.constant 16 : i32
    %172 = vector.broadcast %c16_i32_71 : i32 to vector<4x128xi32>
    %173 = arith.shrsi %167, %172 : vector<4x128xi32>
    %c65535_i32_72 = arith.constant 65535 : i32
    %174 = vector.broadcast %c65535_i32_72 : i32 to vector<4x128xi32>
    %175 = arith.andi %173, %174 : vector<4x128xi32>
    %176 = vector.extract_strided_slice %171 {offsets = [0, 0], sizes = [1, 128], strides = [1, 1]} : vector<4x128xi32> to vector<1x128xi32>
    %177 = arith.cmpi slt, %176, %1 : vector<1x128xi32>
    %c0_i32_73 = arith.constant 0 : i32
    %178 = arith.cmpi eq, %140, %c0_i32_73 : i32
    %179 = vector.extract_strided_slice %171 {offsets = [1, 0], sizes = [1, 128], strides = [1, 1]} : vector<4x128xi32> to vector<1x128xi32>
    %180 = arith.cmpi slt, %179, %2 : vector<1x128xi32>
    %181 = vector.broadcast %178 : i1 to vector<1x128xi1>
    %182 = arith.andi %181, %180 : vector<1x128xi1>
    %183 = vector.extract_strided_slice %175 {offsets = [2, 0], sizes = [1, 128], strides = [1, 1]} : vector<4x128xi32> to vector<1x128xi32>
    %184 = vector.broadcast %142 : i32 to vector<1x128xi32>
    %185 = arith.muli %183, %184 : vector<1x128xi32>
    %c16_i32_74 = arith.constant 16 : i32
    %186 = vector.broadcast %c16_i32_74 : i32 to vector<1x128xi32>
    %187 = arith.shrsi %185, %186 : vector<1x128xi32>
    %188 = vector.broadcast %141 : i32 to vector<1x128xi32>
    %189 = arith.select %182, %188, %187 : vector<1x128xi1>, vector<1x128xi32>
    %190 = vector.extract_strided_slice %175 {offsets = [3, 0], sizes = [1, 128], strides = [1, 1]} : vector<4x128xi32> to vector<1x128xi32>
    %191 = vector.broadcast %143 : i32 to vector<1x128xi32>
    %192 = arith.muli %190, %191 : vector<1x128xi32>
    %c16_i32_75 = arith.constant 16 : i32
    %193 = vector.broadcast %c16_i32_75 : i32 to vector<1x128xi32>
    %194 = arith.shrsi %192, %193 : vector<1x128xi32>
    %c-1_i32_76 = arith.constant -1 : i32
    %195 = vector.broadcast %c-1_i32_76 : i32 to vector<1x128xi32>
    %196 = arith.select %177, %195, %189 : vector<1x128xi1>, vector<1x128xi32>
    %c-1_i32_77 = arith.constant -1 : i32
    %197 = vector.broadcast %c-1_i32_77 : i32 to vector<1x128xi32>
    %198 = arith.select %177, %197, %194 : vector<1x128xi1>, vector<1x128xi32>
    %199 = arith.extui %177 : vector<1x128xi1> to vector<1x128xi32>
    %200 = tpu.concatenate %196, %199, %198, %8 in 0 : vector<1x128xi32>, vector<1x128xi32>, vector<1x128xi32>, vector<5x128xi32> -> vector<8x128xi32>
    %c2_78 = arith.constant 2 : index
    %c0_79 = arith.constant 0 : index
    %c0_80 = arith.constant 0 : index
    %201 = vector.load %arg2[%c2_78, %c0_79, %c0_80] : memref<4x8x128xi32, #tpu.memory_space<vmem>>, vector<1x8x128xi32>
    %202 = vector.shape_cast %201 : vector<1x8x128xi32> to vector<8x128xi32>
    %203 = vector.shape_cast %200 : vector<8x128xi32> to vector<1x8x128xi32>
    tpu.vector_store %arg2[%c2_78, %c0_79, %c0_80], %203 {strides = array<i32>} : memref<4x8x128xi32, #tpu.memory_space<vmem>>, vector<1x8x128xi32>,
    %c3_81 = arith.constant 3 : index
    %c0_82 = arith.constant 0 : index
    %204 = memref.load %arg0[%c3_81, %c0_82] : memref<4x5xi32, #tpu.memory_space<smem>>
    %c3_83 = arith.constant 3 : index
    %c1_84 = arith.constant 1 : index
    %205 = memref.load %arg0[%c3_83, %c1_84] : memref<4x5xi32, #tpu.memory_space<smem>>
    %c3_85 = arith.constant 3 : index
    %c2_86 = arith.constant 2 : index
    %206 = memref.load %arg0[%c3_85, %c2_86] : memref<4x5xi32, #tpu.memory_space<smem>>
    %c3_87 = arith.constant 3 : index
    %c3_88 = arith.constant 3 : index
    %207 = memref.load %arg0[%c3_87, %c3_88] : memref<4x5xi32, #tpu.memory_space<smem>>
    %c3_89 = arith.constant 3 : index
    %c4_90 = arith.constant 4 : index
    %208 = memref.load %arg0[%c3_89, %c4_90] : memref<4x5xi32, #tpu.memory_space<smem>>
    %c-1640531527_i32_91 = arith.constant -1640531527 : i32
    %209 = arith.muli %204, %c-1640531527_i32_91 : i32
    %210 = vector.broadcast %209 : i32 to vector<4x128xi32>
    %211 = arith.xori %7, %210 : vector<4x128xi32>
    %c-1849467071_i32 = arith.constant -1849467071 : i32
    %212 = vector.broadcast %c-1849467071_i32 : i32 to vector<4x128xi32>
    %213 = arith.xori %211, %212 : vector<4x128xi32>
    %c16_i32_92 = arith.constant 16 : i32
    %214 = vector.broadcast %c16_i32_92 : i32 to vector<4x128xi32>
    %215 = arith.shrsi %213, %214 : vector<4x128xi32>
    %c65535_i32_93 = arith.constant 65535 : i32
    %216 = vector.broadcast %c65535_i32_93 : i32 to vector<4x128xi32>
    %217 = arith.andi %215, %216 : vector<4x128xi32>
    %218 = arith.xori %213, %217 : vector<4x128xi32>
    %c2146121005_i32_94 = arith.constant 2146121005 : i32
    %219 = vector.broadcast %c2146121005_i32_94 : i32 to vector<4x128xi32>
    %220 = arith.muli %218, %219 : vector<4x128xi32>
    %c15_i32_95 = arith.constant 15 : i32
    %221 = vector.broadcast %c15_i32_95 : i32 to vector<4x128xi32>
    %222 = arith.shrsi %220, %221 : vector<4x128xi32>
    %c131071_i32_96 = arith.constant 131071 : i32
    %223 = vector.broadcast %c131071_i32_96 : i32 to vector<4x128xi32>
    %224 = arith.andi %222, %223 : vector<4x128xi32>
    %225 = arith.xori %220, %224 : vector<4x128xi32>
    %c-2073254261_i32_97 = arith.constant -2073254261 : i32
    %226 = vector.broadcast %c-2073254261_i32_97 : i32 to vector<4x128xi32>
    %227 = arith.muli %225, %226 : vector<4x128xi32>
    %c16_i32_98 = arith.constant 16 : i32
    %228 = vector.broadcast %c16_i32_98 : i32 to vector<4x128xi32>
    %229 = arith.shrsi %227, %228 : vector<4x128xi32>
    %c65535_i32_99 = arith.constant 65535 : i32
    %230 = vector.broadcast %c65535_i32_99 : i32 to vector<4x128xi32>
    %231 = arith.andi %229, %230 : vector<4x128xi32>
    %232 = arith.xori %227, %231 : vector<4x128xi32>
    %c8_i32_100 = arith.constant 8 : i32
    %233 = vector.broadcast %c8_i32_100 : i32 to vector<4x128xi32>
    %234 = arith.shrsi %232, %233 : vector<4x128xi32>
    %c16777215_i32_101 = arith.constant 16777215 : i32
    %235 = vector.broadcast %c16777215_i32_101 : i32 to vector<4x128xi32>
    %236 = arith.andi %234, %235 : vector<4x128xi32>
    %c16_i32_102 = arith.constant 16 : i32
    %237 = vector.broadcast %c16_i32_102 : i32 to vector<4x128xi32>
    %238 = arith.shrsi %232, %237 : vector<4x128xi32>
    %c65535_i32_103 = arith.constant 65535 : i32
    %239 = vector.broadcast %c65535_i32_103 : i32 to vector<4x128xi32>
    %240 = arith.andi %238, %239 : vector<4x128xi32>
    %241 = vector.extract_strided_slice %236 {offsets = [0, 0], sizes = [1, 128], strides = [1, 1]} : vector<4x128xi32> to vector<1x128xi32>
    %242 = arith.cmpi slt, %241, %1 : vector<1x128xi32>
    %c0_i32_104 = arith.constant 0 : i32
    %243 = arith.cmpi eq, %205, %c0_i32_104 : i32
    %244 = vector.extract_strided_slice %236 {offsets = [1, 0], sizes = [1, 128], strides = [1, 1]} : vector<4x128xi32> to vector<1x128xi32>
    %245 = arith.cmpi slt, %244, %2 : vector<1x128xi32>
    %246 = vector.broadcast %243 : i1 to vector<1x128xi1>
    %247 = arith.andi %246, %245 : vector<1x128xi1>
    %248 = vector.extract_strided_slice %240 {offsets = [2, 0], sizes = [1, 128], strides = [1, 1]} : vector<4x128xi32> to vector<1x128xi32>
    %249 = vector.broadcast %207 : i32 to vector<1x128xi32>
    %250 = arith.muli %248, %249 : vector<1x128xi32>
    %c16_i32_105 = arith.constant 16 : i32
    %251 = vector.broadcast %c16_i32_105 : i32 to vector<1x128xi32>
    %252 = arith.shrsi %250, %251 : vector<1x128xi32>
    %253 = vector.broadcast %206 : i32 to vector<1x128xi32>
    %254 = arith.select %247, %253, %252 : vector<1x128xi1>, vector<1x128xi32>
    %255 = vector.extract_strided_slice %240 {offsets = [3, 0], sizes = [1, 128], strides = [1, 1]} : vector<4x128xi32> to vector<1x128xi32>
    %256 = vector.broadcast %208 : i32 to vector<1x128xi32>
    %257 = arith.muli %255, %256 : vector<1x128xi32>
    %c16_i32_106 = arith.constant 16 : i32
    %258 = vector.broadcast %c16_i32_106 : i32 to vector<1x128xi32>
    %259 = arith.shrsi %257, %258 : vector<1x128xi32>
    %c-1_i32_107 = arith.constant -1 : i32
    %260 = vector.broadcast %c-1_i32_107 : i32 to vector<1x128xi32>
    %261 = arith.select %242, %260, %254 : vector<1x128xi1>, vector<1x128xi32>
    %c-1_i32_108 = arith.constant -1 : i32
    %262 = vector.broadcast %c-1_i32_108 : i32 to vector<1x128xi32>
    %263 = arith.select %242, %262, %259 : vector<1x128xi1>, vector<1x128xi32>
    %264 = arith.extui %242 : vector<1x128xi1> to vector<1x128xi32>
    %265 = tpu.concatenate %261, %264, %263, %8 in 0 : vector<1x128xi32>, vector<1x128xi32>, vector<1x128xi32>, vector<5x128xi32> -> vector<8x128xi32>
    %c3_109 = arith.constant 3 : index
    %c0_110 = arith.constant 0 : index
    %c0_111 = arith.constant 0 : index
    %266 = vector.load %arg2[%c3_109, %c0_110, %c0_111] : memref<4x8x128xi32, #tpu.memory_space<vmem>>, vector<1x8x128xi32>
    %267 = vector.shape_cast %266 : vector<1x8x128xi32> to vector<8x128xi32>
    %268 = vector.shape_cast %265 : vector<8x128xi32> to vector<1x8x128xi32>
    tpu.vector_store %arg2[%c3_109, %c0_110, %c0_111], %268 {strides = array<i32>} : memref<4x8x128xi32, #tpu.memory_space<vmem>>, vector<1x8x128xi32>,
    return
  }
}

</mosaic_0001>

<bundles_post_ra>
// kernel: dummy_dendrite_forward.1
= control target key start
LH: loop header
LB: loop body
LE: loop exit
PB: predicated region body
PF: predicated region fallthrough
CT: control target
= control target key end

     0   :  { %7 = vsyncpa [#allocation3], 0  ;;  %s485_s0 = inlined_call_operand.vmem [shape: s32[4,5], index: 0, kind: input, shape index: {}]   ;;  %s486_s1 = inlined_call_operand.vmem [shape: s32[2,128], index: 1, kind: input, shape index: {}]   ;;  %s487_s2 = inlined_call_operand.vmem [shape: s32[4,8,128], index: 2, kind: output, shape index: {}]  }
   0x1   :  { %s14_s11 = sshll.u32 %s485_s0, 4  ;;  %s15_s11 = int_to_ptr.vmem [resolvable:$true] %s14_s11 }
   0x2   :  { %s285_s12 = scalar_lea.vmem %s15_s11, 64  ;;  %p290_p1 = scmp.lt.s32.totalorder %s15_s11, %s15_s11 }
   0x3   :  { %p286_p0 = scmp.ne.s32.totalorder %s15_s11, %s285_s12  ;;  %p291_p2 = scmp.lt.s32.totalorder %s285_s12, %s285_s12 }
   0x5   :  { %p292_p3 = por %p291_p2, %p290_p1 }
   0x7   :  { %p293_p4 = pnand %p292_p3, %p286_p0 }
   0x9   :  { %296 = shalt.err (!%p293_p4)
}
   0xa   :  { %s299_s13 = smov [#allocation2]  }
   0xb   :  { %17 = dma.vmem_to_smem %s15_s11, 64, %s299_s13, [#allocation3]  }
   0xc   :  { %297 = dma.done.wait [#allocation3], 64  }
   0xd   :  { %298 = vsyncadd [#allocation3], 4294967232 }
   0xe   :  { %23 = sfence }
   0xf   :  { %v25_v0 = vlaneseq  ;;  %s31_s14 = sld [smem:[#allocation2]]  ;;  %s319_s17 = sld [smem:[#allocation2 + $0x1]]  ;;  %v352_v36 = vld [vmem:[%s486_s1] sm:$0x3]  ;;  %vm76_vm1 = vcmask 1040384   ;;  %vm78_vm3 = vcmask 1041408  }
  0x10   :  { %s250_s15 = sld [smem:[#allocation2 + $0x80]]  ;;  %s321_s19 = sld [smem:[#allocation2 + $0x81]]  ;;  %vm80_vm4 = vcmask 1042432   ;;  %v300_v59 = vmov 0  }
  0x11   :  { %v26_v1 = vshrl.u32 %v25_v0, 7  ;;  %v28_v2 = vand.u32 127, %v25_v0  ;;  %s261_s0 = sld [smem:[#allocation2 + $0x100]]  ;;  %s323_s22 = sld [smem:[#allocation2 + $0x2]] }
  0x12   :  { %s272_s21 = sld [smem:[#allocation2 + $0x180]]  ;;  %s325_s23 = sld [smem:[#allocation2 + $0x3]] }
  0x13   :  { %v29_v3 = vmul.u32 128, %v26_v1  ;;  %s327_s24 = sld [smem:[#allocation2 + $0x4]]  ;;  %s330_s25 = sld [smem:[#allocation2 + $0x101]] }
  0x14   :  { %s333_s27 = sld [smem:[#allocation2 + $0x82]]  ;;  %s335_s28 = sld [smem:[#allocation2 + $0x83]] }
  0x15   :  { %s36_s16 = smul.u32 2654435769, %s31_s14  ;;  %v30_v4 = vadd.s32 %v29_v3, %v28_v2  ;;  %p55_p5 = scmp.eq.s32.totalorder %s319_s17, 0 }
  0x16   :  { %s88_s18 = smul.u32 2654435769, %s250_s15  ;;  %p108_p6 = scmp.eq.s32.totalorder %s321_s19, 0 }
  0x17   :  { %v37_v5 = vstv %s36_s16  ;;  %s139_s20 = smul.u32 2654435769, %s261_s0  ;;  %s337_s30 = sld [smem:[#allocation2 + $0x84]]  ;;  %v63_v37 = vstv %s323_s22 }
  0x18   :  { %v38_v6 = vxor.u32 %v37_v5, %v30_v4  ;;  %v89_v8 = vstv %s88_s18  ;;  %s190_s26 = smul.u32 2654435769, %s272_s21  ;;  %s339_s3 = sld [smem:[#allocation2 + $0x103]]  ;;  %v60_v30 = vstv %s325_s23 }
  0x19   :  { %v90_v9 = vxor.u32 %v89_v8, %v30_v4  ;;  %v140_v12 = vstv %s139_s20  ;;  %s56_s29 = scalar_select %p55_p5, 1, 0  ;;  %v66_v38 = vstv %s327_s24 }
  0x1a   :  { %v245_v7 = vshrl.u32 %v38_v6, 16  ;;  %v141_v14 = vxor.u32 %v140_v12, %v30_v4  ;;  %v191_v22 = vstv %s190_s26  ;;  %s343_s4 = scalar_select %p108_p6, 1, 0  ;;  %v113_v47 = vstv %s335_s28 }
  0x1b   :  { %v91_v11 = vxor.u32 2246822507, %v90_v9  ;;  %v192_v25 = vxor.u32 %v191_v22, %v30_v4  ;;  %v57_v33 = vstv %s56_s29  ;;  %s346_s5 = sld [smem:[#allocation2 + $0x104]]  ;;  %p159_p7 = scmp.eq.s32.totalorder %s330_s25, 0  ;;  %v116_v48 = vstv %s333_s27 }
  0x1c   :  { %v41_v10 = vxor.u32 %v245_v7, %v38_v6  ;;  %v142_v17 = vxor.u32 198677718, %v141_v14  ;;  %v110_v40 = vstv %s343_s4  ;;  %vm357_vm0 = vcmp.eq.s32.totalorder %v57_v33, 1  ;;  %s363_s1 = sld [smem:[#allocation2 + $0x181]]  ;;  %s394_s9 = sld [smem:[#allocation2 + $0x102]] }
  0x1d   :  { %v255_v15 = vshrl.u32 %v91_v11, 16  ;;  %v193_v29 = vxor.u32 2445500225, %v192_v25  ;;  %v119_v52 = vstv %s337_s30  ;;  %s373_s8 = scalar_select %p159_p7, 1, 0  ;;  %vm375_vm5 = vcmp.eq.s32.totalorder %v110_v40, 1 }
  0x1e   :  { %v42_v13 = vmul.u32 2146121005, %v41_v10  ;;  %v266_v20 = vshrl.u32 %v142_v17, 16  ;;  %v164_v61 = vstv %s339_s3  ;;  %s398_s10 = sld [smem:[#allocation2 + $0x183]]  ;;  %s400_s11 = sld [smem:[#allocation2 + $0x184]] }
  0x1f   :  { %v94_v18 = vxor.u32 %v255_v15, %v91_v11  ;;  %v277_v35 = vshrl.u32 %v193_v29, 16  ;;  %v161_v4 = vstv %s373_s8  ;;  %s274_s15 = sld [smem:[#allocation2 + $0x182]] }
  0x20   :  { %v246_v16 = vshrl.u32 %v42_v13, 15  ;;  %v145_v24 = vxor.u32 %v266_v20, %v142_v17  ;;  %vm409_vm9 = vcmp.eq.s32.totalorder %v161_v4, 1 }
  0x21   :  { %v95_v21 = vmul.u32 2146121005, %v94_v18  ;;  %v196_v44 = vxor.u32 %v277_v35, %v193_v29  ;;  %v170_v5 = vstv %s346_s5 }
  0x22   :  { %v45_v19 = vxor.u32 %v246_v16, %v42_v13  ;;  %v146_v28 = vmul.u32 2146121005, %v145_v24  ;;  %p210_p8 = scmp.eq.s32.totalorder %s363_s1, 0 }
  0x23   :  { %v256_v26 = vshrl.u32 %v95_v21, 15  ;;  %v197_v56 = vmul.u32 2146121005, %v196_v44 }
  0x24   :  { %v46_v23 = vmul.u32 2221713035, %v45_v19  ;;  %v267_v34 = vshrl.u32 %v146_v28, 15  ;;  %s211_s12 = scalar_select %p210_p8, 1, 0  ;;  %v215_v45 = vstv %s398_s10  ;;  %v221_v49 = vstv %s400_s11 }
  0x25   :  { %v98_v31 = vxor.u32 %v256_v26, %v95_v21  ;;  %v278_v1 = vshrl.u32 %v197_v56, 15 }
  0x26   :  { %v247_v27 = vshrl.u32 %v46_v23, 16  ;;  %v149_v43 = vxor.u32 %v267_v34, %v146_v28 }
  0x27   :  { %v99_v39 = vmul.u32 2221713035, %v98_v31  ;;  %v200_v13 = vxor.u32 %v278_v1, %v197_v56 }
  0x28   :  { %v49_v32 = vxor.u32 %v247_v27, %v46_v23  ;;  %v150_v55 = vmul.u32 2221713035, %v149_v43 }
  0x29   :  { %v257_v46 = vshrl.u32 %v99_v39, 16  ;;  %v201_v25 = vmul.u32 2221713035, %v200_v13 }
  0x2a   :  { %v248_v41 = vshrl.u32 %v49_v32, 8  ;;  %v249_v42 = vshrl.u32 %v49_v32, 16  ;;  %v268_v0 = vshrl.u32 %v150_v55, 16 }
  0x2b   :  { %v102_v53 = vxor.u32 %v257_v46, %v99_v39  ;;  %v167_v39 = vstv %s394_s9 }
  0x2c   :  { %vm366_vm2 = vcmp.lt.s32.totalorder %v248_v41, %v352_v36  ;;  %v61_v50 = vmul.u32 %v249_v42, %v60_v30  ;;  %v67_v51 = vmul.u32 %v249_v42, %v66_v38  ;;  %v153_v9 = vxor.u32 %v268_v0, %v150_v55 }
  0x2d   :  { %v73_v60 = vsel %vm366_vm2, 1, %v300_v59  ;;  %vm59_vm6 = vmand %vm357_vm0, %vm366_vm2  ;;  %v258_v62 = vshrl.u32 %v102_v53, 8  ;;  %v259_v63 = vshrl.u32 %v102_v53, 16  ;;  %v279_v42 = vshrl.u32 %v201_v25, 16 }
  0x2e   :  { %v62_v57 = vshra.s32 %v61_v50, 16  ;;  %v68_v58 = vshra.s32 %v67_v51, 16  ;;  %v74_v12 = vrot.slane %v73_v60, 7  ;;  %v269_v19 = vshrl.u32 %v153_v9, 8 }
  0x2f   :  { %vm390_vm7 = vcmp.lt.s32.totalorder %v258_v62, %v352_v36  ;;  %v114_v7 = vmul.u32 %v259_v63, %v113_v47  ;;  %v120_v8 = vmul.u32 %v259_v63, %v119_v52  ;;  %v270_v20 = vshrl.u32 %v153_v9, 16 }
  0x30   :  { %v64_v2 = vrot.slane %v62_v57, 1  ;;  %v71_v3 = vrot.slane %v68_v58, 3  ;;  %vm112_vm8 = vmand %vm375_vm5, %vm390_vm7  ;;  %v126_v18 = vsel %vm390_vm7, 1, %v300_v59  ;;  %vm418_vm10 = vcmp.lt.s32.totalorder %v269_v19, %v352_v36 }
  0x31   :  { %v115_v16 = vshra.s32 %v114_v7, 16  ;;  %v121_v17 = vshra.s32 %v120_v8, 16  ;;  %v165_v28 = vmul.u32 %v270_v20, %v164_v61  ;;  %v171_v29 = vmul.u32 %v270_v20, %v170_v5  ;;  %vm163_vm11 = vmand %vm409_vm9, %vm418_vm10 }
  0x32   :  { %v65_v10 = vsel %vm59_vm6, %v63_v37, %v64_v2  ;;  %v72_v11 = vsel %vm366_vm2, 4294967295, %v71_v3  ;;  %v127_v33 = vrot.slane %v126_v18, 7  ;;  %v177_v41 = vsel %vm418_vm10, 1, %v300_v59 }
  0x33   :  { %v69_v14 = vrot.slane %v65_v10, 1  ;;  %v75_v15 = vrot.slane %v72_v11, 6  ;;  %v117_v23 = vrot.slane %v115_v16, 1  ;;  %v124_v24 = vrot.slane %v121_v17, 3 }
  0x34   :  { %v166_v38 = vshra.s32 %v165_v28, 16  ;;  %v172_v40 = vshra.s32 %v171_v29, 16  ;;  %v178_v52 = vrot.slane %v177_v41, 7  ;;  %v212_v53 = vstv %s211_s12 }
  0x35   :  { %v70_v22 = vsel %vm366_vm2, 4294967295, %v69_v14  ;;  %v118_v31 = vsel %vm112_vm8, %v116_v48, %v117_v23  ;;  %v125_v32 = vsel %vm390_vm7, 4294967295, %v124_v24  ;;  %v204_v48 = vxor.u32 %v279_v42, %v201_v25 }
  0x36   :  { %v77_v26 = vsel %vm76_vm1, %v70_v22, %v74_v12  ;;  %v122_v35 = vrot.slane %v118_v31, 1  ;;  %v128_v37 = vrot.slane %v125_v32, 6  ;;  %v168_v44 = vrot.slane %v166_v38, 1 }
  0x37   :  { %v79_v30 = vsel %vm78_vm3, %v77_v26, %v75_v15  ;;  %v175_v47 = vrot.slane %v172_v40, 3  ;;  %v280_v57 = vshrl.u32 %v204_v48, 8  ;;  %v281_v60 = vshrl.u32 %v204_v48, 16 }
  0x38   :  { %v81_v34 = vsel %vm80_vm4, %v79_v30, 0  ;;  %v123_v43 = vsel %vm390_vm7, 4294967295, %v122_v35  ;;  %v169_v51 = vsel %vm163_vm11, %v167_v39, %v168_v44  ;;  %vm453_vm12 = vcmp.eq.s32.totalorder %v212_v53, 1 }
  0x39   :  { %82 = vst [vmem:[%s487_s2] sm:$0xff] %v81_v34  ;;  %v129_v46 = vsel %vm76_vm1, %v123_v43, %v127_v33  ;;  %v173_v55 = vrot.slane %v169_v51, 1  ;;  %v176_v56 = vsel %vm418_vm10, 4294967295, %v175_v47  ;;  %vm459_vm13 = vcmp.lt.s32.totalorder %v280_v57, %v352_v36 }
  0x3a   :  { %v130_v50 = vsel %vm78_vm3, %v129_v46, %v128_v37  ;;  %v179_v58 = vrot.slane %v176_v56, 6  ;;  %v216_v1 = vmul.u32 %v281_v60, %v215_v45  ;;  %v222_v2 = vmul.u32 %v281_v60, %v221_v49  ;;  %vm214_vm14 = vmand %vm453_vm12, %vm459_vm13 }
  0x3b   :  { %v131_v54 = vsel %vm80_vm4, %v130_v50, 0  ;;  %v174_v61 = vsel %vm418_vm10, 4294967295, %v173_v55  ;;  %v218_v36 = vstv %s274_s15  ;;  %v228_v7 = vsel %vm459_vm13, 1, %v300_v59 }
  0x3c   :  { %260 = vst [vmem:[%s487_s2 + $0x8] sm:$0xff] %v131_v54  ;;  %v180_v63 = vsel %vm76_vm1, %v174_v61, %v178_v52  ;;  %v217_v5 = vshra.s32 %v216_v1, 16  ;;  %v223_v6 = vshra.s32 %v222_v2, 16  ;;  %v229_v12 = vrot.slane %v228_v7, 7 }
  0x3d   :  { %v181_v3 = vsel %vm78_vm3, %v180_v63, %v179_v58 }
  0x3e   :  { %v182_v4 = vsel %vm80_vm4, %v181_v3, 0  ;;  %v219_v8 = vrot.slane %v217_v5, 1  ;;  %v226_v9 = vrot.slane %v223_v6, 3 }
  0x3f   :  { %271 = vst [vmem:[%s487_s2 + $0x10] sm:$0xff] %v182_v4 }
  0x40   :  { %v220_v10 = vsel %vm214_vm14, %v218_v36, %v219_v8  ;;  %v227_v11 = vsel %vm459_vm13, 4294967295, %v226_v9 }
  0x41   :  { %v224_v13 = vrot.slane %v220_v10, 1  ;;  %v230_v14 = vrot.slane %v227_v11, 6 }
  0x43   :  { %v225_v15 = vsel %vm459_vm13, 4294967295, %v224_v13 }
  0x44   :  { %v231_v16 = vsel %vm76_vm1, %v225_v15, %v229_v12 }
  0x45   :  { %v232_v17 = vsel %vm78_vm3, %v231_v16, %v230_v14 }
  0x46   :  { %v233_v18 = vsel %vm80_vm4, %v232_v17, 0 }
  0x47   :  { %282 = vst [vmem:[%s487_s2 + $0x18] sm:$0xff] %v233_v18 }
  0x48   :  { %240 = vsyncpa [#allocation3], 1 }

</bundles_post_ra>
